<compile_context>
chip_gen: v7x
topology: tpu7x:2x2x1
jax: 0.10.0
libtpu: 0.0.40
codegen_flags: <defaults>
</compile_context>

<pallas_src>
import jax
import jax.numpy as jnp
from jax.experimental import pallas as pl
from jax.experimental.pallas import tpu as pltpu


def _split_relu_kernel(xr_ref, xi_ref, or_ref, oi_ref):
    # Pure VPU elementwise work on one (block_rows, lane) tile of each plane.
    or_ref[...] = jnp.maximum(xr_ref[...], 0.0)
    oi_ref[...] = jnp.maximum(xi_ref[...], 0.0)


def _round_up(x, m):
    return ((x + m - 1) // m) * m


def _plan_tiling(n):
    """Pick a lane-dense 2D layout (rows, lane) and a row-block size.

    lane is a multiple of 128 (wide preferred, zero padding preferred); the
    per-tile size is capped at ~1 MiB f32 so that 2 inputs + 2 outputs, each
    double-buffered, stay at ~8 MiB of VMEM on every TPU generation.
    """
    for lane in (2048, 1024, 512, 256, 128):
        if n % lane == 0:
            rows = n // lane
            break
    else:
        lane = 512
        rows = pl.cdiv(n, lane)

    max_block_rows = max(8, (256 * 1024) // lane)  # ~1 MiB f32 per tile
    if rows <= max_block_rows:
        block_rows = rows          # one block spans the full row dim (legal)
    else:
        block_rows = max_block_rows          # multiple of 8 (lane <= 2048)
        rows = _round_up(rows, block_rows)   # pad rows to a block multiple
    return rows, lane, block_rows


@jax.jit
def split_activation(x_complex):
    """Applies f(real) + 1j * f(imag) with f = ReLU; ReLU runs in Pallas."""
    # For complex64 these are already float32; astype guards complex128 input.
    xr = jnp.real(x_complex).astype(jnp.float32)
    xi = jnp.imag(x_complex).astype(jnp.float32)
    orig_shape = xr.shape
    n = xr.size

    rows, lane, block_rows = _plan_tiling(n)
    padded = rows * lane

    xr_f = xr.reshape(-1)
    xi_f = xi.reshape(-1)
    if padded != n:
        # Only reached for sizes with no multiple-of-128 factorization.
        xr_f = jnp.pad(xr_f, (0, padded - n))
        xi_f = jnp.pad(xi_f, (0, padded - n))
    xr_f = xr_f.reshape(rows, lane)
    xi_f = xi_f.reshape(rows, lane)

    blk = pl.BlockSpec((block_rows, lane), lambda i: (i, 0))

    out_r, out_i = pl.pallas_call(
        _split_relu_kernel,
        out_shape=(
            jax.ShapeDtypeStruct((rows, lane), jnp.float32),
            jax.ShapeDtypeStruct((rows, lane), jnp.float32),
        ),
        grid_spec=pltpu.PrefetchScalarGridSpec(
            num_scalar_prefetch=0,
            grid=(rows // block_rows,),
            in_specs=[blk, blk],
            out_specs=[blk, blk],
        ),
        input_output_aliases={0: 0, 1: 1},
        compiler_params=pltpu.CompilerParams(
            dimension_semantics=("parallel",),
        ),
    )(xr_f, xi_f)

    out_r = out_r.reshape(-1)
    out_i = out_i.reshape(-1)
    if padded != n:
        out_r = out_r[:n]
        out_i = out_i[:n]
    return jax.lax.complex(out_r.reshape(orig_shape), out_i.reshape(orig_shape))


if __name__ == "__main__":
    key = jax.random.PRNGKey(0)
    kr, ki = jax.random.split(key)
    # NCHW complex input, matching the PyTorch module's conv-style usage.
    N, C, H, W = 2, 4, 16, 16
    x_real = jax.random.normal(kr, (N, C, H, W), dtype=jnp.float32)
    x_imag = jax.random.normal(ki, (N, C, H, W), dtype=jnp.float32)
    x = jax.lax.complex(x_real, x_imag)

    out = jax.block_until_ready(split_activation(x))

    # Pure-JAX reference: f(real) + 1j * f(imag), f = ReLU.
    ref = jax.lax.complex(jnp.maximum(x_real, 0.0), jnp.maximum(x_imag, 0.0))
    assert out.dtype == jnp.complex64
    assert out.shape == (N, C, H, W)
    assert jnp.allclose(jnp.real(out), jnp.real(ref), atol=1e-6)
    assert jnp.allclose(jnp.imag(out), jnp.imag(ref), atol=1e-6)

    print("KERNEL_OK")
</pallas_src>

<mosaic_0001>
module attributes {stable_mosaic.version = 11 : i64} {
  func.func @_split_relu_kernel(%arg0: i32, %arg1: memref<1x2048xf32, #tpu.memory_space<vmem>>, %arg2: memref<1x2048xf32, #tpu.memory_space<vmem>>, %arg3: memref<1x2048xf32, #tpu.memory_space<vmem>>, %arg4: memref<1x2048xf32, #tpu.memory_space<vmem>>) attributes {dimension_semantics = [#tpu.dimension_semantics<parallel>], iteration_bounds = array<i64: 1>, scalar_prefetch = 0 : i64, scratch_operands = 0 : i64, tpu.core_type = #tpu.core_type<tc>, window_params = [{transform_indices = @transform_0, window_bounds = array<i64: 1, 2048>}, {transform_indices = @transform_1, window_bounds = array<i64: 1, 2048>}, {transform_indices = @transform_2, window_bounds = array<i64: 1, 2048>}, {transform_indices = @transform_3, window_bounds = array<i64: 1, 2048>}]} {
    %c0 = arith.constant 0 : index
    %c0_0 = arith.constant 0 : index
    %0 = vector.load %arg1[%c0, %c0_0] : memref<1x2048xf32, #tpu.memory_space<vmem>>, vector<1x2048xf32>
    %cst = arith.constant 0.000000e+00 : f32
    %1 = vector.broadcast %cst : f32 to vector<1x2048xf32>
    %2 = arith.maximumf %0, %1 : vector<1x2048xf32>
    %c0_1 = arith.constant 0 : index
    %c0_2 = arith.constant 0 : index
    %3 = vector.load %arg3[%c0_1, %c0_2] : memref<1x2048xf32, #tpu.memory_space<vmem>>, vector<1x2048xf32>
    tpu.vector_store %arg3[%c0_1, %c0_2], %2 {strides = array<i32>} : memref<1x2048xf32, #tpu.memory_space<vmem>>, vector<1x2048xf32>,
    %c0_3 = arith.constant 0 : index
    %c0_4 = arith.constant 0 : index
    %4 = vector.load %arg2[%c0_3, %c0_4] : memref<1x2048xf32, #tpu.memory_space<vmem>>, vector<1x2048xf32>
    %cst_5 = arith.constant 0.000000e+00 : f32
    %5 = vector.broadcast %cst_5 : f32 to vector<1x2048xf32>
    %6 = arith.maximumf %4, %5 : vector<1x2048xf32>
    %c0_6 = arith.constant 0 : index
    %c0_7 = arith.constant 0 : index
    %7 = vector.load %arg4[%c0_6, %c0_7] : memref<1x2048xf32, #tpu.memory_space<vmem>>, vector<1x2048xf32>
    tpu.vector_store %arg4[%c0_6, %c0_7], %6 {strides = array<i32>} : memref<1x2048xf32, #tpu.memory_space<vmem>>, vector<1x2048xf32>,
    return
  }
  func.func @transform_0(%arg0: i32) -> (i32, i32) {
    %c0_i32 = arith.constant 0 : i32
    %c0_i32_0 = arith.constant 0 : i32
    return %arg0, %c0_i32 : i32, i32
  }
  func.func @transform_1(%arg0: i32) -> (i32, i32) {
    %c0_i32 = arith.constant 0 : i32
    %c0_i32_0 = arith.constant 0 : i32
    return %arg0, %c0_i32 : i32, i32
  }
  func.func @transform_2(%arg0: i32) -> (i32, i32) {
    %c0_i32 = arith.constant 0 : i32
    %c0_i32_0 = arith.constant 0 : i32
    return %arg0, %c0_i32 : i32, i32
  }
  func.func @transform_3(%arg0: i32) -> (i32, i32) {
    %c0_i32 = arith.constant 0 : i32
    %c0_i32_0 = arith.constant 0 : i32
    return %arg0, %c0_i32 : i32, i32
  }
}

</mosaic_0001>

<bundles_post_ra>
// kernel: custom-call
= control target key start
LH: loop header
LB: loop body
LE: loop exit
PB: predicated region body
PF: predicated region fallthrough
CT: control target
= control target key end

     0   :  { %2 = vsyncpa [#allocation0], 0  ;;  %s61_s0 = inlined_call_operand.hbm [shape: c64[2,4,16,16], index: 0, kind: input, shape index: {}]   ;;  %s62_s1 = inlined_call_operand.vmem [shape: f32[2,4,16,16], index: 1, kind: output, shape index: {}]  }
   0x1   :  { %s3_s8 = sshll.u32 %s62_s1, 4  ;;  %s9_s11 = scalar_lea.hbm %s61_s0, 2048  ;;  %s4_s8 = int_to_ptr.vmem [resolvable:$true] %s3_s8 }
   0x2   :  { %p10_p0 = scmp.ne.s32.totalorder %s61_s0, %s9_s11  ;;  %s11_s16 = scalar_lea.hbm %s61_s0, 4096 }
   0x3   :  { %p12_p1 = scmp.lt.u32.totalorder %s11_s16, %s9_s11  ;;  %p13_p2 = scmp.lt.u32.totalorder %s9_s11, %s61_s0 }
   0x5   :  { %p14_p3 = por %p13_p2, %p12_p1 }
   0x7   :  { %p15_p4 = pnand %p14_p3, %p10_p0 }
   0x9   :  { %18 = shalt.err (!%p15_p4)  }
   0xa   :  { %s19_s1 = scalar_lea.vmem %s4_s8, 2048  ;;  %p24_p6 = scmp.lt.s32.totalorder %s4_s8, %s4_s8 }
   0xb   :  { %p20_p5 = scmp.ne.s32.totalorder %s4_s8, %s19_s1  ;;  %p25_p7 = scmp.lt.s32.totalorder %s19_s1, %s19_s1 }
   0xd   :  { %p26_p8 = por %p25_p7, %p24_p6 }
   0xf   :  { %p27_p9 = pnand %p26_p8, %p20_p5 }
  0x11   :  { %30 = shalt.err (!%p27_p9)  }
  0x12   :  { %6 = dma.hbm_to_vmem [thread:$0]  %s61_s0, 2048, %s4_s8, [#allocation0] }
  0x13   :  { %31 = dma.done.wait [#allocation0], 2048  }
  0x14   :  { %32 = vsyncadd [#allocation0], 4294965248 }
  0x15   :  { %8 = vsyncpa [#allocation0], 1 }

// kernel: custom-call.1
= control target key start
LH: loop header
LB: loop body
LE: loop exit
PB: predicated region body
PF: predicated region fallthrough
CT: control target
= control target key end

     0   :  { %s59_s0 = inlined_call_operand.hbm [shape: c64[2,4,16,16], index: 0, kind: input, shape index: {}]   ;;  %s60_s1 = inlined_call_operand.vmem [shape: f32[2,4,16,16], index: 1, kind: output, shape index: {}]  }
   0x1   :  { %s2_s8 = scalar_lea.hbm %s59_s0, 2048 }
   0x2   :  { %3 = vsyncpa [#allocation0], 0  ;;  %s4_s11 = sshll.u32 %s60_s1, 4  ;;  %s34_s14 = scalar_lea.hbm %s59_s0, 4096  ;;  %s5_s11 = int_to_ptr.vmem [resolvable:$true] %s4_s11 }
   0x3   :  { %p11_p0 = scmp.ne.s32.totalorder %s2_s8, %s34_s14  ;;  %p13_p1 = scmp.lt.u32.totalorder %s2_s8, %s59_s0 }
   0x4   :  { %p14_p2 = scmp.lt.u32.totalorder %s34_s14, %s34_s14  ;;  %p16_p4 = scmp.lt.u32.totalorder %s34_s14, %s2_s8 }
   0x6   :  { %p15_p3 = por %p14_p2, %p13_p1 }
   0x8   :  { %p17_p5 = por %p16_p4, %p15_p3 }
   0xa   :  { %p18_p6 = pnand %p17_p5, %p11_p0 }
   0xc   :  { %21 = shalt.err (!%p18_p6)  }
   0xd   :  { %s22_s17 = scalar_lea.vmem %s5_s11, 2048  ;;  %p27_p8 = scmp.lt.s32.totalorder %s5_s11, %s5_s11 }
   0xe   :  { %p23_p7 = scmp.ne.s32.totalorder %s5_s11, %s22_s17  ;;  %p28_p9 = scmp.lt.s32.totalorder %s22_s17, %s22_s17 }
  0x10   :  { %p29_p10 = por %p28_p9, %p27_p8 }
  0x12   :  { %p30_p11 = pnand %p29_p10, %p23_p7 }
  0x14   :  { %33 = shalt.err (!%p30_p11)  }
  0x15   :  { %7 = dma.hbm_to_vmem [thread:$0]  %s2_s8, 2048, %s5_s11, [#allocation0] }
  0x16   :  { %35 = dma.done.wait [#allocation0], 2048  }
  0x17   :  { %36 = vsyncadd [#allocation0], 4294965248 }
  0x18   :  { %9 = vsyncpa [#allocation0], 1 }

// kernel: custom-call.2
= control target key start
LH: loop header
LB: loop body
LE: loop exit
PB: predicated region body
PF: predicated region fallthrough
CT: control target
= control target key end

     0   :  { %s126_s0 = inlined_call_operand.vmem [shape: f32[2,4,16,16], index: 0, kind: input, shape index: {}]   ;;  %s127_s1 = inlined_call_operand.vmem [shape: f32[2,4,16,16], index: 1, kind: input, shape index: {}]   ;;  %s128_s2 = inlined_call_operand.hbm [shape: c64[2,4,16,16], index: 2, kind: output, shape index: {}]  }
   0x1   :  { %s87_s11 = scalar_lea.hbm %s128_s2, 2048 }
   0x2   :  { %4 = vsyncpa [#allocation0], 0  ;;  %s5_s14 = sshll.u32 %s126_s0, 4  ;;  %s6_s14 = int_to_ptr.vmem [resolvable:$true] %s5_s14 }
   0x3   :  { %s18_s15 = scalar_lea.vmem %s6_s14, 2048  ;;  %p23_p1 = scmp.lt.s32.totalorder %s6_s14, %s6_s14 }
   0x4   :  { %p19_p0 = scmp.ne.s32.totalorder %s6_s14, %s18_s15  ;;  %p24_p2 = scmp.lt.s32.totalorder %s18_s15, %s18_s15 }
   0x6   :  { %p25_p3 = por %p24_p2, %p23_p1 }
   0x8   :  { %p26_p4 = pnand %p25_p3, %p19_p0 }
   0xa   :  { %29 = shalt.err (!%p26_p4)  }
   0xb   :  { %p31_p5 = scmp.ne.s32.totalorder %s128_s2, %s87_s11  ;;  %s32_s0 = scalar_lea.hbm %s128_s2, 4096 }
   0xc   :  { %p33_p6 = scmp.lt.u32.totalorder %s32_s0, %s87_s11  ;;  %p34_p7 = scmp.lt.u32.totalorder %s87_s11, %s128_s2 }
   0xe   :  { %p35_p8 = por %p34_p7, %p33_p6 }
  0x10   :  { %p36_p9 = pnand %p35_p8, %p31_p5 }
  0x12   :  { %39 = shalt.err (!%p36_p9)  }
  0x13   :  { %8 = dma.vmem_to_hbm [thread:$0]  %s6_s14, 2048, %s128_s2, [#allocation0] }
  0x14   :  { %65 = dma.done.wait [#allocation0], 2048  }
  0x15   :  { %66 = vsyncadd [#allocation0], 4294965248 }
  0x16   :  { %10 = vsyncpa [#allocation0], 1 }
  0x17   :  { %11 = vsyncpa [#allocation1], 0  ;;  %s12_s28 = sshll.u32 %s127_s1, 4  ;;  %s13_s28 = int_to_ptr.vmem [resolvable:$true] %s12_s28 }
  0x18   :  { %s40_s29 = scalar_lea.vmem %s13_s28, 2048  ;;  %p45_p11 = scmp.lt.s32.totalorder %s13_s28, %s13_s28 }
  0x19   :  { %p41_p10 = scmp.ne.s32.totalorder %s13_s28, %s40_s29  ;;  %p46_p12 = scmp.lt.s32.totalorder %s40_s29, %s40_s29 }
  0x1b   :  { %p47_p13 = por %p46_p12, %p45_p11 }
  0x1d   :  { %p48_p0 = pnand %p47_p13, %p41_p10 }
  0x1f   :  { %51 = shalt.err (!%p48_p0)  }
  0x20   :  { %p53_p1 = scmp.ne.s32.totalorder %s87_s11, %s32_s0  ;;  %p56_p2 = scmp.lt.u32.totalorder %s32_s0, %s32_s0 }
  0x22   :  { %p57_p3 = por %p56_p2, %p34_p7 }
  0x24   :  { %p59_p4 = por %p57_p3, %p33_p6 }
  0x26   :  { %p60_p5 = pnand %p59_p4, %p53_p1 }
  0x28   :  { %63 = shalt.err (!%p60_p5)  }
  0x29   :  { %15 = dma.vmem_to_hbm [thread:$0]  %s13_s28, 2048, %s87_s11, [#allocation1] }
  0x2a   :  { %67 = dma.done.wait [#allocation1], 2048  }
  0x2b   :  { %68 = vsyncadd [#allocation1], 4294965248 }
  0x2c   :  { %17 = vsyncpa [#allocation1], 1 }

// kernel: split_activation.1
= control target key start
LH: loop header
LB: loop body
LE: loop exit
PB: predicated region body
PF: predicated region fallthrough
CT: control target
= control target key end

     0   :  { %s77_s0 = inlined_call_operand.vmem [shape: f32[1,2048], index: 0, kind: input, shape index: {}, may-alias: {0,2}]   ;;  %s78_s1 = inlined_call_operand.vmem [shape: f32[1,2048], index: 1, kind: input, shape index: {}, may-alias: {1,3}]   ;;  %s79_s2 = inlined_call_operand.vmem [shape: f32[1,2048], index: 2, kind: output, shape index: {0}, may-alias: {0,2}]   ;;  %s80_s3 = inlined_call_operand.vmem [shape: f32[1,2048], index: 3, kind: output, shape index: {1}, may-alias: {1,3}]  }
   0x1   :  { %v13_v0 = vld [vmem:[%s77_s0] sm:$0xff]  ;;  %v14_v1 = vld [vmem:[%s77_s0 + $0x8] sm:$0xff] }
   0x2   :  { %v19_v2 = vld [vmem:[%s78_s1] sm:$0xff]  ;;  %v15_v3 = vmax.f32 %v13_v0, 0.0  ;;  %v16_v4 = vmax.f32 %v14_v1, 0.0  ;;  %v20_v6 = vld [vmem:[%s78_s1 + $0x8] sm:$0xff] }
   0x3   :  { %v21_v5 = vmax.f32 %v19_v2, 0.0  ;;  %v22_v7 = vmax.f32 %v20_v6, 0.0 }
   0x4   :  { %17 = vst [vmem:[%s79_s2] sm:$0xff] %v15_v3  ;;  %18 = vst [vmem:[%s79_s2 + $0x8] sm:$0xff] %v16_v4 }
   0x5   :  { %23 = vst [vmem:[%s80_s3] sm:$0xff] %v21_v5  ;;  %24 = vst [vmem:[%s80_s3 + $0x8] sm:$0xff] %v22_v7 }

</bundles_post_ra>
